<compile_context>
chip_gen: v7x
topology: tpu7x:2x2x1
jax: 0.10.0
libtpu: 0.0.40
codegen_flags: <defaults>
</compile_context>

<pallas_src>
import jax
import jax.numpy as jnp
from jax import lax
from jax.experimental import pallas as pl
from jax.experimental.pallas import tpu as pltpu


def _attention_kernel(qb_ref, k_ref, ua_wt_ref, va_w_ref, ctx_ref, wts_ref):
    # qb_ref    : (Bt, 1, D)  precomputed  query @ Wa.T + wa_b + ua_b
    # k_ref     : (Bt, T, D)  keys block
    # ua_wt_ref : (D, D)      Ua.weight pre-transposed (kernel does k @ Ua.T)
    # va_w_ref  : (1, D)      Va.weight row (Va.bias folded out)
    k = k_ref[...]                                                    # (Bt, T, D)

    # Ua(keys) without bias: one MXU matmul over all Bt*T rows.
    kU = lax.dot_general(
        k, ua_wt_ref[...],
        dimension_numbers=(((2,), (0,)), ((), ())),
        preferred_element_type=jnp.float32)                           # (Bt, T, D)

    # tanh(Wa(q) + Ua(k)); both biases already folded into qb.
    h = jnp.tanh(kU + qb_ref[...])                                    # (Bt, T, D)

    # Va score: lane reduction over D.  Va.bias dropped (softmax shift-invariant).
    scores = jnp.sum(h * va_w_ref[...], axis=-1)                      # (Bt, T)

    # Numerically stable softmax over the key/time axis (lane axis), f32.
    m = jnp.max(scores, axis=-1, keepdims=True)
    e = jnp.exp(scores - m)
    w = e / jnp.sum(e, axis=-1, keepdims=True)                        # (Bt, T)

    # context = weights @ keys  per batch row -> (Bt, D)
    ctx = jnp.sum(w[:, :, None] * k, axis=1)                          # (Bt, D)

    ctx_ref[...] = ctx.astype(ctx_ref.dtype)
    wts_ref[...] = w.astype(wts_ref.dtype)


def _pick_batch_block(B, T, target_rows=256):
    """Pick a batch block Bt (divisor of B) so Bt*T is ~target_rows.

    Bt is either the whole batch or a multiple of 8, so the 2-D (Bt, D)/(Bt, T)
    output blocks satisfy the TPU (8, 128) block-layout rule.
    """
    want = max(1, target_rows // max(T, 1))
    if B <= want:
        return B
    for bt in range(min(want, B), 0, -1):
        if B % bt == 0 and bt % 8 == 0:
            return bt
    return B  # fall back to whole batch (always legal)


@jax.jit
def nn_attention(query, keys, wa_w, wa_b, ua_w, ua_b, va_w, va_b):
    B, Tq, D = query.shape
    _, T, _ = keys.shape
    assert Tq == 1, "module semantics require a single query step (B, 1, D)"

    f32 = jnp.float32
    query = query.astype(f32)
    keys = keys.astype(f32)

    # Hoist the query projection out of the kernel (one batched XLA matmul)
    # and fold both linear biases into it:  Wa(q) + Ua(k) = (q@Wa.T + wa_b + ua_b) + k@Ua.T
    qb = query @ wa_w.astype(f32).T + (wa_b + ua_b).astype(f32)       # (B, 1, D)

    ua_wt = ua_w.astype(f32).T          # pre-transposed so kernel does k @ Ua.T
    va_w2 = va_w.reshape(1, D).astype(f32)
    # va_b intentionally unused: softmax is shift-invariant.

    Bt = _pick_batch_block(B, T)
    grid = (B // Bt,)

    in_specs = [
        pl.BlockSpec((Bt, 1, D), lambda b: (b, 0, 0)),   # qb (query proj + biases)
        pl.BlockSpec((Bt, T, D), lambda b: (b, 0, 0)),   # keys block
        pl.BlockSpec((D, D), lambda b: (0, 0)),          # Ua.weight^T (resident)
        pl.BlockSpec((1, D), lambda b: (0, 0)),          # Va.weight   (resident)
    ]
    out_specs = [
        pl.BlockSpec((Bt, D), lambda b: (b, 0)),         # context, lane-dense
        pl.BlockSpec((Bt, T), lambda b: (b, 0)),         # weights, lane-dense
    ]
    out_shape = [
        jax.ShapeDtypeStruct((B, D), f32),
        jax.ShapeDtypeStruct((B, T), f32),
    ]

    ctx2, w2 = pl.pallas_call(
        _attention_kernel,
        grid=grid,
        in_specs=in_specs,
        out_specs=out_specs,
        out_shape=out_shape,
        compiler_params=pltpu.CompilerParams(
            dimension_semantics=("parallel",)),
    )(qb, keys, ua_wt, va_w2)

    # Restore the module's output shapes.
    return ctx2[:, None, :], w2[:, None, :]


def _reference(query, keys, wa_w, wa_b, ua_w, ua_b, va_w, va_b):
    # Pure-JAX reference mirroring the PyTorch forward.
    qW = query @ wa_w.T + wa_b           # (B, 1, D)
    kU = keys @ ua_w.T + ua_b            # (B, T, D)
    h = jnp.tanh(qW + kU)                # (B, T, D)
    scores = h @ va_w.T + va_b           # (B, T, 1)
    scores = scores[..., 0][:, None, :]  # (B, 1, T)
    weights = jax.nn.softmax(scores, axis=-1)
    context = jnp.einsum("bqt,btd->bqd", weights, keys)
    return context, weights


if __name__ == "__main__":
    B, T, D = 2, 8, 32
    key = jax.random.PRNGKey(0)
    k_q, k_k, k_w1, k_b1, k_w2, k_b2, k_w3, k_b3 = jax.random.split(key, 8)

    query = jax.random.normal(k_q, (B, 1, D), dtype=jnp.float32)
    keys = jax.random.normal(k_k, (B, T, D), dtype=jnp.float32)

    # Deterministic parameter init (uniform, roughly matching nn.Linear scale).
    bound = 1.0 / (D ** 0.5)
    wa_w = jax.random.uniform(k_w1, (D, D), minval=-bound, maxval=bound)
    wa_b = jax.random.uniform(k_b1, (D,), minval=-bound, maxval=bound)
    ua_w = jax.random.uniform(k_w2, (D, D), minval=-bound, maxval=bound)
    ua_b = jax.random.uniform(k_b2, (D,), minval=-bound, maxval=bound)
    va_w = jax.random.uniform(k_w3, (1, D), minval=-bound, maxval=bound)
    va_b = jax.random.uniform(k_b3, (1,), minval=-bound, maxval=bound)

    context, weights = nn_attention(query, keys, wa_w, wa_b, ua_w, ua_b, va_w, va_b)
    jax.block_until_ready((context, weights))

    ref_ctx, ref_w = _reference(query, keys, wa_w, wa_b, ua_w, ua_b, va_w, va_b)
    assert context.shape == (B, 1, D) and weights.shape == (B, 1, T)
    assert jnp.allclose(context, ref_ctx, atol=1e-5, rtol=1e-5)
    assert jnp.allclose(weights, ref_w, atol=1e-5, rtol=1e-5)

    print("KERNEL_OK")
</pallas_src>

<mosaic_0001>
module attributes {stable_mosaic.version = 11 : i64} {
  func.func @_attention_kernel(%arg0: i32, %arg1: memref<2x1x32xf32, #tpu.memory_space<vmem>>, %arg2: memref<2x8x32xf32, #tpu.memory_space<vmem>>, %arg3: memref<32x32xf32, #tpu.memory_space<vmem>>, %arg4: memref<1x32xf32, #tpu.memory_space<vmem>>, %arg5: memref<2x32xf32, #tpu.memory_space<vmem>>, %arg6: memref<2x8xf32, #tpu.memory_space<vmem>>) attributes {dimension_semantics = [#tpu.dimension_semantics<parallel>], iteration_bounds = array<i64: 1>, scalar_prefetch = 0 : i64, scratch_operands = 0 : i64, tpu.core_type = #tpu.core_type<tc>, window_params = [{transform_indices = @transform_0, window_bounds = array<i64: 2, 1, 32>}, {transform_indices = @transform_1, window_bounds = array<i64: 2, 8, 32>}, {pipeline_mode = #tpu.pipeline_mode<synchronous>, transform_indices = @transform_2, window_bounds = array<i64: 32, 32>}, {pipeline_mode = #tpu.pipeline_mode<synchronous>, transform_indices = @transform_3, window_bounds = array<i64: 1, 32>}, {transform_indices = @transform_4, window_bounds = array<i64: 2, 32>}, {transform_indices = @transform_5, window_bounds = array<i64: 2, 8>}]} {
    %c0 = arith.constant 0 : index
    %c0_0 = arith.constant 0 : index
    %c0_1 = arith.constant 0 : index
    %0 = vector.load %arg2[%c0, %c0_0, %c0_1] : memref<2x8x32xf32, #tpu.memory_space<vmem>>, vector<2x8x32xf32>
    %c0_2 = arith.constant 0 : index
    %c0_3 = arith.constant 0 : index
    %1 = vector.load %arg3[%c0_2, %c0_3] : memref<32x32xf32, #tpu.memory_space<vmem>>, vector<32x32xf32>
    %cst = arith.constant dense<0.000000e+00> : vector<2x8x32xf32>
    %2 = tpu.matmul %0, %1, %cst {dimension_numbers = #tpu.dot_dimension_numbers<[2], [0], [0, 1], [1], [0, 0, 0, 1, 1, 1], [], []>} : vector<2x8x32xf32>, vector<32x32xf32>, vector<2x8x32xf32> -> vector<2x8x32xf32>
    %c0_4 = arith.constant 0 : index
    %c0_5 = arith.constant 0 : index
    %c0_6 = arith.constant 0 : index
    %3 = vector.load %arg1[%c0_4, %c0_5, %c0_6] : memref<2x1x32xf32, #tpu.memory_space<vmem>>, vector<2x1x32xf32>
    %4 = vector.broadcast %3 : vector<2x1x32xf32> to vector<2x8x32xf32>
    %5 = arith.addf %2, %4 : vector<2x8x32xf32>
    %6 = math.tanh %5 : vector<2x8x32xf32>
    %c0_7 = arith.constant 0 : index
    %c0_8 = arith.constant 0 : index
    %7 = vector.load %arg4[%c0_7, %c0_8] : memref<1x32xf32, #tpu.memory_space<vmem>>, vector<1x32xf32>
    %8 = vector.shape_cast %7 : vector<1x32xf32> to vector<1x1x32xf32>
    %9 = vector.broadcast %8 : vector<1x1x32xf32> to vector<2x8x32xf32>
    %10 = arith.mulf %6, %9 : vector<2x8x32xf32>
    %cst_9 = arith.constant dense<0.000000e+00> : vector<2x8xf32>
    %11 = vector.multi_reduction <add>, %10, %cst_9 [2] : vector<2x8x32xf32> to vector<2x8xf32>
    %cst_10 = arith.constant dense<0xFF800000> : vector<2xf32>
    %12 = vector.multi_reduction <maximumf>, %11, %cst_10 [1] : vector<2x8xf32> to vector<2xf32>
    %13 = vector.shape_cast %12 : vector<2xf32> to vector<2x1xf32>
    %14 = vector.broadcast %13 : vector<2x1xf32> to vector<2x8xf32>
    %15 = arith.subf %11, %14 : vector<2x8xf32>
    %16 = math.exp %15 : vector<2x8xf32>
    %cst_11 = arith.constant dense<0.000000e+00> : vector<2xf32>
    %17 = vector.multi_reduction <add>, %16, %cst_11 [1] : vector<2x8xf32> to vector<2xf32>
    %18 = vector.shape_cast %17 : vector<2xf32> to vector<2x1xf32>
    %19 = vector.broadcast %18 : vector<2x1xf32> to vector<2x8xf32>
    %20 = arith.divf %16, %19 : vector<2x8xf32>
    %21 = vector.shape_cast %20 : vector<2x8xf32> to vector<2x8x1xf32>
    %22 = vector.broadcast %21 : vector<2x8x1xf32> to vector<2x8x32xf32>
    %23 = arith.mulf %22, %0 : vector<2x8x32xf32>
    %cst_12 = arith.constant dense<0.000000e+00> : vector<2x32xf32>
    %24 = vector.multi_reduction <add>, %23, %cst_12 [1] : vector<2x8x32xf32> to vector<2x32xf32>
    %c0_13 = arith.constant 0 : index
    %c0_14 = arith.constant 0 : index
    %25 = vector.load %arg5[%c0_13, %c0_14] : memref<2x32xf32, #tpu.memory_space<vmem>>, vector<2x32xf32>
    tpu.vector_store %arg5[%c0_13, %c0_14], %24 {strides = array<i32>} : memref<2x32xf32, #tpu.memory_space<vmem>>, vector<2x32xf32>,
    %c0_15 = arith.constant 0 : index
    %c0_16 = arith.constant 0 : index
    %26 = vector.load %arg6[%c0_15, %c0_16] : memref<2x8xf32, #tpu.memory_space<vmem>>, vector<2x8xf32>
    tpu.vector_store %arg6[%c0_15, %c0_16], %20 {strides = array<i32>} : memref<2x8xf32, #tpu.memory_space<vmem>>, vector<2x8xf32>,
    return
  }
  func.func @transform_0(%arg0: i32) -> (i32, i32, i32) {
    %c0_i32 = arith.constant 0 : i32
    %c0_i32_0 = arith.constant 0 : i32
    %c0_i32_1 = arith.constant 0 : i32
    return %arg0, %c0_i32, %c0_i32_0 : i32, i32, i32
  }
  func.func @transform_1(%arg0: i32) -> (i32, i32, i32) {
    %c0_i32 = arith.constant 0 : i32
    %c0_i32_0 = arith.constant 0 : i32
    %c0_i32_1 = arith.constant 0 : i32
    return %arg0, %c0_i32, %c0_i32_0 : i32, i32, i32
  }
  func.func @transform_2(%arg0: i32) -> (i32, i32) {
    %c0_i32 = arith.constant 0 : i32
    %c0_i32_0 = arith.constant 0 : i32
    %c0_i32_1 = arith.constant 0 : i32
    return %c0_i32, %c0_i32_0 : i32, i32
  }
  func.func @transform_3(%arg0: i32) -> (i32, i32) {
    %c0_i32 = arith.constant 0 : i32
    %c0_i32_0 = arith.constant 0 : i32
    %c0_i32_1 = arith.constant 0 : i32
    return %c0_i32, %c0_i32_0 : i32, i32
  }
  func.func @transform_4(%arg0: i32) -> (i32, i32) {
    %c0_i32 = arith.constant 0 : i32
    %c0_i32_0 = arith.constant 0 : i32
    return %arg0, %c0_i32 : i32, i32
  }
  func.func @transform_5(%arg0: i32) -> (i32, i32) {
    %c0_i32 = arith.constant 0 : i32
    %c0_i32_0 = arith.constant 0 : i32
    return %arg0, %c0_i32 : i32, i32
  }
}

</mosaic_0001>

<bundles_post_ra>
// kernel: nn_attention.1
= control target key start
LH: loop header
LB: loop body
LE: loop exit
PB: predicated region body
PF: predicated region fallthrough
CT: control target
= control target key end

     0   :  { %11 = vsyncpa [#allocation3], 0  ;;  %vm41_vm0 = vcmask 261120   ;;  %s483_s0 = inlined_call_operand.vmem [shape: f32[2,1,32], index: 0, kind: input, shape index: {}]   ;;  %s484_s1 = inlined_call_operand.vmem [shape: f32[2,8,32], index: 1, kind: input, shape index: {}]   ;;  %s485_s2 = inlined_call_operand.vmem [shape: f32[32,32], index: 2, kind: input, shape index: {}]   ;;  %s486_s3 = inlined_call_operand.vmem [shape: f32[1,32], index: 3, kind: input, shape index: {}]   ;;  %s487_s4 = inlined_call_operand.hbm [shape: f32[2,32], index: 4, kind: output, shape index: {0}]   ;;  %s488_s5 = inlined_call_operand.hbm [shape: f32[2,8], index: 5, kind: output, shape index: {1}]  }
   0x1   :  { %v23_v0 = vld [vmem:[%s485_s2] sm:$0xff]  ;;  %v24_v1 = vld [vmem:[%s485_s2 + $0x8] sm:$0xff]  ;;  %v25_v2 = vld [vmem:[%s485_s2 + $0x10] sm:$0xff] }
   0x2   :  { %v305_v3 = vpack.c.bf16 %v24_v1, %v23_v0  ;;  %v26_v4 = vld [vmem:[%s485_s2 + $0x18] sm:$0xff]  ;;  %v426_v5 = vld [vmem:[%s484_s1] sm:$0xff] }
   0x3   :  { %v309_v6 = vpack.c.bf16 %v26_v4, %v25_v2  ;;  %302 = vmatprep.mubr.msk.f32.mxu0 %vm41_vm0, %v426_v5 }
   0x4   :  { %12 = vsyncpa [#allocation5], 0  ;;  %306 = vmatprep.subr.bf16.mxu0 %v305_v3  ;;  %v433_v7 = vld [vmem:[%s484_s1 + $0x8] sm:$0xff]  ;;  %v284_v8 = vld [vmem:[%s483_s0 + $0x1] ss:$0 sm:$0xff]  ;;  %v142_v21 = vlaneseq  ;;  %vm152_vm1 = vcmask 1041409  }
   0x5   :  { %308 = vmatpush3.bf16.msra.mxu0 %v305_v3  ;;  %v283_v9 = vld [vmem:[%s483_s0] ss:$0 sm:$0xff]  ;;  %vm155_vm2 = vcmask 58368   ;;  %v378_v31 = vmov 0   ;;  %s379_s0 = smov [#allocation4]  }
   0x6   :  { %310 = vmatprep.subr.bf16.mxu0 %v309_v6  ;;  %v287_v14 = vld [vmem:[%s486_s3] ss:$0 sm:$0xff]  ;;  %v143_v22 = vand.u32 127, %v142_v21  ;;  %v145_v23 = vshrl.u32 %v142_v21, 7  ;;  %317 = vset.pattern.permute.xlu0 %v378_v31  ;;  %s271_s3 = sshll.u32 %s379_s0, 4  ;;  %s272_s3 = int_to_ptr.vmem [resolvable:$true] %s271_s3 }
   0x7   :  { %316 = vset.pattern.permute.xlu1 %v378_v31  ;;  %s330_s9 = scalar_lea.vmem %s272_s3, 32  ;;  %p335_p1 = scmp.lt.s32.totalorder %s272_s3, %s272_s3 }
   0x8   :  { %v146_v25 = vsub.s32 %v143_v22, %v145_v23  ;;  %v162_v32 = vsub.s32 0, %v145_v23  ;;  %v166_v33 = vsub.s32 1, %v145_v23  ;;  %p331_p0 = scmp.ne.s32.totalorder %s272_s3, %s330_s9  ;;  %p336_p2 = scmp.lt.s32.totalorder %s330_s9, %s330_s9 }
   0x9   :  { %312 = vmatpush3.bf16.msra.mxu0 %v309_v6 }
   0xa   :  { %p337_p3 = por %p336_p2, %p335_p1 }
   0xc   :  { %303 = vmatmul.mubr.msk.f32.vlgmr.msra.gmra.mrb[0].mxu0 %vm41_vm0, %v433_v7  ;;  %p338_p4 = pnand %p337_p3, %p331_p0 }
  0xdf   :  { %v304_v10 = vpop.f32.mrb[0].mxu0 }
  0xe0   :  { %v120_v11 = vadd.f32 %v304_v10, %v284_v8  ;;  %v114_v12 = vpop.f32.mrb[1].mxu0 }
  0xe1   :  { %v115_v13 = vadd.f32 %v283_v9, %v114_v12 }
  0xe2   :  { %318 = vtanh.f32 %v120_v11 }
  0xe3   :  { %320 = vtanh.f32 %v115_v13 }
  0xec   :  { %v319_v15 = vpop.eup %318 }
  0xed   :  { %v321_v16 = vpop.eup %320  ;;  %v133_v19 = vmul.f32 %v319_v15, %v287_v14 }
  0xee   :  { %v132_v17 = vmul.f32 %v321_v16, %v287_v14 }
  0xef   :  { %v137_v20 = vsel %vm41_vm0, %v133_v19, 0.0 }
  0xf0   :  { %v134_v18 = vsel %vm41_vm0, %v132_v17, 0.0 }
  0xf1   :  { %135 = vadd.xlane.f32.xlu0 %v134_v18 }
  0xf5   :  { %138 = vadd.xlane.f32.xlu0 %v137_v20 }
 0x17e   :  { %v136_v24 = vpop.xlane.xlu0 %135 }
 0x17f   :  { %v147_v27 = vrot.slane %v136_v24, %v146_v25 }
 0x182   :  { %v139_v26 = vpop.xlane.xlu0 %138 }
 0x183   :  { %v151_v28 = vrot.slane %v139_v26, %v146_v25 }
 0x185   :  { %v153_v29 = vsel %vm152_vm1, %v151_v28, %v147_v27 }
 0x186   :  { %v156_v30 = vsel %vm155_vm2, %v153_v29, -inf }
 0x187   :  { %157 = vmax.xlane.f32.xlu1 %v156_v30 }
 0x214   :  { %v158_v34 = vpop.xlane.xlu1 %157 }
 0x215   :  { %v163_v35 = vrot.slane %v158_v34, %v162_v32  ;;  %v167_v36 = vrot.slane %v158_v34, %v166_v33 }
 0x217   :  { %v170_v37 = vsub.f32 %v136_v24, %v163_v35  ;;  %v171_v38 = vsub.f32 %v139_v26, %v167_v36 }
 0x219   :  { %v172_v39 = vmul.f32 1.442695, %v170_v37  ;;  %v174_v40 = vmul.f32 1.442695, %v171_v38 }
 0x21b   :  { %322 = vpow2.f32 %v172_v39 }
 0x21c   :  { %324 = vpow2.f32 %v174_v40 }
 0x225   :  { %v323_v41 = vpop.eup %322 }
 0x226   :  { %v325_v42 = vpop.eup %324  ;;  %179 = vperm.xlu1 %316, %v323_v41  }
 0x227   :  { %182 = vperm.xlu0 %317, %v325_v42  }
 0x2a5   :  { %v180_v43 = vpop.permute.xlu1 %179 }
 0x2a6   :  { %v183_v44 = vpop.permute.xlu0 %182  ;;  %v187_v45 = vrot.slane %v180_v43, %v146_v25 }
 0x2a7   :  { %v191_v46 = vrot.slane %v183_v44, %v146_v25 }
 0x2a9   :  { %v192_v47 = vsel %vm152_vm1, %v191_v46, %v187_v45 }
 0x2aa   :  { %v194_v48 = vsel %vm155_vm2, %v192_v47, 0.0 }
 0x2ab   :  { %195 = vadd.xlane.f32.xlu1 %v194_v48 }
 0x338   :  { %v196_v49 = vpop.xlane.xlu1 %195 }
 0x339   :  { %v201_v50 = vrot.slane %v196_v49, %v162_v32  ;;  %v205_v51 = vrot.slane %v196_v49, %v166_v33 }
 0x33b   :  { %326 = vrcp.f32 %v201_v50 }
 0x33c   :  { %328 = vrcp.f32 %v205_v51 }
 0x345   :  { %v327_v52 = vpop.eup %326 }
 0x346   :  { %v209_v53 = vmul.f32 %v327_v52, %v323_v41  ;;  %v329_v54 = vpop.eup %328 }
 0x347   :  { %v211_v55 = vmul.f32 %v329_v54, %v325_v42 }
 0x348   :  { %214 = vperm.xlu0 %317, %v209_v53  }
 0x34c   :  { %219 = vperm.xlu0 %317, %v211_v55  }
 0x3c7   :  { %v215_v56 = vpop.permute.xlu0 %214 }
 0x3c8   :  { %v222_v57 = vmul.f32 %v215_v56, %v426_v5  ;;  %v247_v61 = vrot.slane %v215_v56, %v146_v25 }
 0x3ca   :  { %v224_v58 = vsel %vm41_vm0, %v222_v57, 0.0 }
 0x3cb   :  { %v225_v59 = vrot.slane %v224_v58, 4  ;;  %v220_v60 = vpop.permute.xlu0 %219 }
 0x3cc   :  { %v223_v62 = vmul.f32 %v220_v60, %v433_v7  ;;  %v251_v63 = vrot.slane %v220_v60, %v146_v25 }
 0x3cd   :  { %v226_v0 = vadd.f32 %v225_v59, %v224_v58 }
 0x3ce   :  { %v231_v1 = vsel %vm41_vm0, %v223_v62, 0.0  ;;  %v252_v2 = vsel %vm152_vm1, %v251_v63, %v247_v61 }
 0x3cf   :  { %v227_v3 = vrot.slane %v226_v0, 2  ;;  %v232_v4 = vrot.slane %v231_v1, 4  ;;  %254 = vst.msk [vmem:[#allocation4] sm:$0x3] %vm155_vm2, %v252_v2 }
 0x3d0   :  { %341 = shalt.err (!%p338_p4)
}
 0x3d1   :  { %s342_s12 = scalar_lea.hbm %s488_s5, 32 }
 0x3d2   :  { %p343_p5 = scmp.ne.s32.totalorder %s488_s5, %s342_s12  ;;  %p346_p6 = scmp.lt.u32.totalorder %s342_s12, %s488_s5 }
 0x3d4   :  { %p348_p7 = pnand %p346_p6, %p343_p5 }
 0x3d6   :  { %351 = shalt.err (!%p348_p7)
}
 0x3d7   :  { %274 = dma.vmem_to_hbm [thread:$0]  %s272_s3, 32, %s488_s5, [#allocation5]   ;;  %v228_v5 = vadd.f32 %v227_v3, %v226_v0  ;;  %v233_v6 = vadd.f32 %v232_v4, %v231_v1  ;;  %vm242_vm3 = vcmask 254976  }
 0x3d8   :  { %s380_s19 = smov [#allocation2]  }
 0x3d9   :  { %v234_v7 = vrot.slane %v233_v6, 2  ;;  %v229_v9 = vrot.slane %v228_v5, 1  ;;  %s261_s20 = sshll.u32 %s380_s19, 4  ;;  %s262_s20 = int_to_ptr.vmem [resolvable:$true] %s261_s20 }
 0x3da   :  { %s352_s21 = scalar_lea.vmem %s262_s20, 32  ;;  %p357_p9 = scmp.lt.s32.totalorder %s262_s20, %s262_s20 }
 0x3db   :  { %v235_v8 = vadd.f32 %v234_v7, %v233_v6  ;;  %v230_v11 = vadd.f32 %v229_v9, %v228_v5  ;;  %p353_p8 = scmp.ne.s32.totalorder %s262_s20, %s352_s21  ;;  %p358_p10 = scmp.lt.s32.totalorder %s352_s21, %s352_s21 }
 0x3dd   :  { %v236_v10 = vrot.slane %v235_v8, 1  ;;  %p359_p11 = por %p358_p10, %p357_p9 }
 0x3df   :  { %v237_v12 = vadd.f32 %v236_v10, %v235_v8  ;;  %p360_p12 = pnand %p359_p11, %p353_p8 }
 0x3e1   :  { %v240_v13 = vsel %vm152_vm1, %v237_v12, %v230_v11 }
 0x3e2   :  { %243 = vst.msk [vmem:[#allocation2] sm:$0x3] %vm242_vm3, %v240_v13 }
 0x3e3   :  { %363 = shalt.err (!%p360_p12)
}
 0x3e4   :  { %s364_s23 = scalar_lea.hbm %s487_s4, 32 }
 0x3e5   :  { %p365_p13 = scmp.ne.s32.totalorder %s487_s4, %s364_s23  ;;  %p368_p0 = scmp.lt.u32.totalorder %s364_s23, %s487_s4 }
 0x3e7   :  { %p370_p1 = pnand %p368_p0, %p365_p13 }
 0x3e9   :  { %373 = shalt.err (!%p370_p1)
}
 0x3ea   :  { %264 = dma.vmem_to_hbm [thread:$0]  %s262_s20, 32, %s487_s4, [#allocation3]  }
 0x3eb   :  { %374 = dma.done.wait [#allocation3], 32  }
 0x3ec   :  { %375 = vsyncadd [#allocation3], 4294967264 }
 0x3ed   :  { %376 = dma.done.wait [#allocation5], 32  }
 0x3ee   :  { %377 = vsyncadd [#allocation5], 4294967264 }
 0x3ef   :  { %281 = vsyncpa [#allocation3], 1 }
 0x3f0   :  { %282 = vsyncpa [#allocation5], 1 }

</bundles_post_ra>
